<compile_context>
chip_gen: v5e
topology: v5e:2x2
jax: 0.10.0
libtpu: 0.0.40
codegen_flags: <defaults>
</compile_context>

<pallas_src>
import numpy as np
import jax
import jax.numpy as jnp
from jax.experimental import pallas as pl
from jax.experimental.pallas import tpu as pltpu


# ----------------------------------------------------------------------------
# Host-side PPR preprocessing — literal port of calc_ppr_topk_parallel_gpu
# (including the reference's COO-as-indptr indexing quirk), done in numpy.
# TODO(synk): the queue-driven push-flow PPR (data-dependent while loop,
# dynamic queue membership test, per-node top-k) has no clean Pallas
# equivalent; it is computed on host and fed to the kernel as a dense matrix.
# ----------------------------------------------------------------------------
def calc_ppr_topk_host(adj, alpha, epsilon, topk):
    adj = np.asarray(adj, dtype=np.float32)
    n = adj.shape[0]
    rows, cols = np.nonzero(adj)          # same ordering as torch .to_sparse()
    indptr, indices = rows, cols          # mirrors the reference code verbatim
    deg = adj.sum(1)
    ppr = np.zeros((n, n), dtype=np.float32)
    alpha_eps = alpha * epsilon
    for inode in range(n):
        p = np.zeros(n, dtype=np.float32)
        r = np.zeros(n, dtype=np.float32)
        r[inode] = alpha
        q = [inode]
        while q:
            unode = int(q.pop())
            res = r[unode]
            p[unode] += res
            r[unode] = 0.0
            neighbors = indices[indptr[unode]:indptr[unode + 1]]
            deg_unode = deg[unode]
            for vnode in neighbors:
                vnode = int(vnode)
                _val = (1.0 - alpha) * res / deg_unode
                r[vnode] += _val
                if r[vnode] >= alpha_eps * deg[vnode] and vnode not in q:
                    q.append(vnode)
        order = np.argsort(-p, kind="stable")[:topk]
        ppr[inode, order] = p[order]
    deg_sqrt = np.sqrt(np.clip(deg, 1e-12, None))
    deg_inv_sqrt = 1.0 / deg_sqrt
    rl, cl = np.nonzero(ppr)
    ppr[rl, cl] *= deg_sqrt[rl] * deg_inv_sqrt[cl]
    return ppr


# ----------------------------------------------------------------------------
# Kernel A: row-tiled projection.  HW = h @ Wpad (stored bf16);
# h12 = HW_f32 @ [a1 | a2] (kept f32 — it feeds the logits).
# ----------------------------------------------------------------------------
def project_kernel(h_ref, w_ref, a12_ref, hw_ref, h12_ref):
    hw = jnp.dot(h_ref[...], w_ref[...], preferred_element_type=jnp.float32)
    hw_ref[...] = hw.astype(jnp.bfloat16)
    h12_ref[...] = jnp.dot(hw, a12_ref[...], preferred_element_type=jnp.float32)


# ----------------------------------------------------------------------------
# Kernel B: row-slab masked-softmax attention.  One (tm, N) slab of the bf16
# PPR and int8 adjacency mask per grid step; HW (bf16) and h2^T are residents.
# ----------------------------------------------------------------------------
def attention_kernel(a_ppr_ref, h1_ref, h2t_ref, hw_ref, ppr_ref, adj_ref, out_ref):
    # e = LeakyReLU_0.2(h1 + h2^T + a_ppr * PPR) on a (tm, N) query-row slab.
    e = h1_ref[...] + h2t_ref[...] + a_ppr_ref[0, 0] * ppr_ref[...].astype(jnp.float32)
    e = jnp.maximum(e, 0.2 * e)                        # LeakyReLU(0.2): 2 VPU ops
    # Non-neighbours -> -9e15 (native int8 compare, no f32 cast of the mask).
    att = jnp.where(adj_ref[...] > 0, e, jnp.float32(-9e15))
    att = att - jnp.max(att, axis=1, keepdims=True)    # softmax over dim=1 (keys)
    num = jnp.exp(att)
    denom = jnp.sum(num, axis=1, keepdims=True)        # (tm, 1)
    # P-cast: bf16 numerator x bf16 HW on the MXU with f32 accumulation; then
    # normalize AFTER the matmul with an EUP reciprocal on the (tm, 1) denom
    # (a (tm, Fpad) scale instead of a (tm, N) divide).
    o = jnp.dot(num.astype(jnp.bfloat16), hw_ref[...],
                preferred_element_type=jnp.float32)
    out_ref[...] = o * pl.reciprocal(denom, approx=True)


# ----------------------------------------------------------------------------
# Tiling helpers.
# ----------------------------------------------------------------------------
def _round_up(x, m):
    return ((x + m - 1) // m) * m


_ROW_TILES = (2048, 1024, 512, 256, 128, 64, 32)   # multiples of 32 only


def _pick_row_tile(n_rows, per_row_bytes, budget_bytes, candidates=_ROW_TILES):
    """Largest row tile (multiple of 32, divides n_rows) fitting the VMEM budget."""
    for t in candidates:
        if t <= n_rows and n_rows % t == 0 and t * per_row_bytes <= budget_bytes:
            return t
    return 32   # n_rows is always padded to a multiple of 256, so 32 divides it


def _vmem_budget_and_limit():
    """Generation-aware VMEM budget: ~104/112 MiB on 128 MiB parts (v5e/v6e),
    ~40/48 MiB on 64 MiB parts (v7x)."""
    mib = 1024 * 1024
    try:
        cap = int(pltpu.get_tpu_info().vmem_capacity_bytes)
    except Exception:
        cap = 64 * mib                       # conservative fallback, fits any gen
    limit = max(cap - 16 * mib, 32 * mib)    # headroom below physical capacity
    budget = limit - 8 * mib                 # headroom for compiler temporaries
    return budget, limit


# ----------------------------------------------------------------------------
# Forward wrapper.
# ----------------------------------------------------------------------------
def pprgat_forward(h, W, a, a_ppr, ppr, adj):
    n, fin = h.shape
    fout = W.shape[1]
    fpad = _round_up(fout, 128)              # lane-dense feature axis
    npad = _round_up(n, 256)                 # padded query-row axis (32-aligned slabs)

    # Zero-pad the feature axis: padded HW columns stay exactly zero through
    # every matmul, so results are unchanged after slicing.
    Wp = jnp.pad(W, ((0, 0), (0, fpad - fout)))
    a12 = jnp.concatenate([a[:fout, :], a[fout:, :]], axis=1)      # (Fout, 2)
    a12p = jnp.pad(a12, ((0, fpad - fout), (0, 0)))                # (Fpad, 2)
    h_pad = jnp.pad(h, ((0, npad - n), (0, 0)))                    # (Npad, Fin)

    # Shrunk N×N streams for kernel B: bf16 PPR (pre-softmax logit bias only)
    # and an int8 0/1 neighbour mask ((adj > 0) so weighted adjacencies stay
    # correct).  Padded query rows are fully masked and sliced off at the end.
    ppr_b = jnp.pad(ppr.astype(jnp.bfloat16), ((0, npad - n), (0, 0)))
    adj_b = jnp.pad((adj > 0).astype(jnp.int8), ((0, npad - n), (0, 0)))

    vmem_budget, vmem_limit = _vmem_budget_and_limit()
    params = pltpu.CompilerParams(
        dimension_semantics=("parallel",),   # row slabs shard across v7x's 2 TCs
        vmem_limit_bytes=vmem_limit,
    )

    # ---- Kernel A: projection (own, large row tile — per-row VMEM is tiny) ----
    per_row_a = 2 * (fin * 4 + fpad * 2 + 2 * 4) + fpad * 4        # streams + f32 HW temp
    resident_a = 2 * (fin * fpad * 4 + fpad * 2 * 4)               # W + a12 (dbl-buffered)
    tm_a = _pick_row_tile(npad, per_row_a,
                          max(vmem_budget - resident_a, 32 * per_row_a),
                          candidates=(8192, 4096) + _ROW_TILES)

    hw_full, h12 = pl.pallas_call(
        project_kernel,
        out_shape=(jax.ShapeDtypeStruct((npad, fpad), jnp.bfloat16),
                   jax.ShapeDtypeStruct((npad, 2), jnp.float32)),
        grid=(npad // tm_a,),
        in_specs=[pl.BlockSpec((tm_a, fin), lambda i: (i, 0)),
                  pl.BlockSpec((fin, fpad), lambda i: (0, 0)),
                  pl.BlockSpec((fpad, 2), lambda i: (0, 0))],
        out_specs=(pl.BlockSpec((tm_a, fpad), lambda i: (i, 0)),
                   pl.BlockSpec((tm_a, 2), lambda i: (i, 0))),
        compiler_params=params,
    )(h_pad, Wp, a12p)

    # Layout plumbing: per-query-row column h1 (padded rows are already zero),
    # the lane-dense broadcast row h2^T and the key-side HW limited to true N.
    hw_keys = hw_full[:n]                    # (N, Fpad)  bf16
    h1 = h12[:, 0:1]                         # (Npad, 1)  f32
    h2t = h12[:n, 1].reshape(1, n)           # (1, N)     f32

    # ---- Kernel B: row-slab masked-softmax attention ---------------------------
    # VMEM accounting per query row: double-buffered streamed slabs + the
    # materialized (tm, N) f32 softmax temporaries + the bf16 MXU numerator.
    per_row = (2 * (n * 2)        # PPR slab (bf16), double-buffered
               + 2 * n            # adjacency mask slab (int8), double-buffered
               + 2 * 4            # h1 column
               + 2 * (fpad * 4)   # f32 output slab
               + 2 * (n * 4)      # f32 softmax temporaries (e/att, num)
               + n * 2)           # bf16 numerator fed to the MXU
    resident = 2 * (n * fpad * 2) + 2 * (n * 4)   # HW (bf16) + h2^T (f32) blocks
    tm = _pick_row_tile(npad, per_row, max(vmem_budget - resident, 32 * per_row))

    out_pad = pl.pallas_call(
        attention_kernel,
        out_shape=jax.ShapeDtypeStruct((npad, fpad), jnp.float32),
        grid=(npad // tm,),
        in_specs=[pl.BlockSpec(memory_space=pltpu.MemorySpace.SMEM),  # a_ppr (1,1) scalar
                  pl.BlockSpec((tm, 1), lambda i: (i, 0)),            # h1 row-tile
                  pl.BlockSpec((1, n), lambda i: (0, 0)),             # h2^T (resident)
                  pl.BlockSpec((n, fpad), lambda i: (0, 0)),          # HW (resident, bf16)
                  pl.BlockSpec((tm, n), lambda i: (i, 0)),            # PPR slab (bf16)
                  pl.BlockSpec((tm, n), lambda i: (i, 0))],           # adj mask (int8)
        out_specs=pl.BlockSpec((tm, fpad), lambda i: (i, 0)),
        compiler_params=params,
    )(a_ppr, h1, h2t, hw_keys, ppr_b, adj_b)

    return out_pad[:n, :fout]


if __name__ == "__main__":
    n_nodes, in_features, out_features = 32, 16, 16
    alpha, epsilon, topk = 0.25, 0.0001, 32   # module constants

    key = jax.random.PRNGKey(0)
    k_h, k_adj, k_w, k_a, k_ap = jax.random.split(key, 5)

    # node features
    h = jax.random.normal(k_h, (n_nodes, in_features), dtype=jnp.float32)

    # symmetric 0/1 adjacency with self-loops (every node has degree >= 1)
    up = jax.random.bernoulli(k_adj, 0.25, (n_nodes, n_nodes))
    adj_bool = jnp.logical_or(up, up.T)
    adj_bool = jnp.logical_or(adj_bool, jnp.eye(n_nodes, dtype=bool))
    adj = adj_bool.astype(jnp.float32)

    # deterministic xavier_uniform_(gain=1.414) parameter init
    def xavier(k, shape, gain=1.414):
        bound = gain * float(np.sqrt(6.0 / (shape[0] + shape[1])))
        return jax.random.uniform(k, shape, jnp.float32, -bound, bound)

    W = xavier(k_w, (in_features, out_features))
    a = xavier(k_a, (2 * out_features, 1))
    a_ppr = xavier(k_ap, (1, 1))

    # host PPR preprocessing (f32 — feeds the pre-softmax logits)
    ppr = jnp.asarray(calc_ppr_topk_host(np.asarray(adj), alpha, epsilon, topk))

    out = pprgat_forward(h, W, a, a_ppr, ppr, adj)
    jax.block_until_ready(out)
    assert out.shape == (n_nodes, out_features) and out.dtype == jnp.float32

    # Pure-JAX f32 reference (same math as the PyTorch module); loose tolerance
    # because the kernel keeps HW / PPR / the softmax numerator in bf16.
    HW = h @ W
    e = HW @ a[:out_features] + (HW @ a[out_features:]).T + a_ppr * ppr
    e = jnp.where(e > 0, e, 0.2 * e)
    att = jax.nn.softmax(jnp.where(adj > 0, e, jnp.float32(-9e15)), axis=1)
    ref = att @ HW
    assert np.allclose(np.asarray(out), np.asarray(ref), rtol=3e-2, atol=3e-2), (
        "max abs err = %g" % float(jnp.max(jnp.abs(out - ref))))
    print("KERNEL_OK")
</pallas_src>

<mosaic_0001>
module attributes {stable_mosaic.version = 11 : i64} {
  func.func @project_kernel(%arg0: i32, %arg1: memref<256x16xf32, #tpu.memory_space<vmem>>, %arg2: memref<16x128xf32, #tpu.memory_space<vmem>>, %arg3: memref<128x2xf32, #tpu.memory_space<vmem>>, %arg4: memref<256x128xbf16, #tpu.memory_space<vmem>>, %arg5: memref<256x2xf32, #tpu.memory_space<vmem>>) attributes {dimension_semantics = [#tpu.dimension_semantics<parallel>], iteration_bounds = array<i64: 1>, scalar_prefetch = 0 : i64, scratch_operands = 0 : i64, tpu.core_type = #tpu.core_type<tc>, window_params = [{transform_indices = @transform_0, window_bounds = array<i64: 256, 16>}, {pipeline_mode = #tpu.pipeline_mode<synchronous>, transform_indices = @transform_1, window_bounds = array<i64: 16, 128>}, {pipeline_mode = #tpu.pipeline_mode<synchronous>, transform_indices = @transform_2, window_bounds = array<i64: 128, 2>}, {transform_indices = @transform_3, window_bounds = array<i64: 256, 128>}, {transform_indices = @transform_4, window_bounds = array<i64: 256, 2>}]} {
    %c0 = arith.constant 0 : index
    %c0_0 = arith.constant 0 : index
    %0 = vector.load %arg1[%c0, %c0_0] : memref<256x16xf32, #tpu.memory_space<vmem>>, vector<256x16xf32>
    %c0_1 = arith.constant 0 : index
    %c0_2 = arith.constant 0 : index
    %1 = vector.load %arg2[%c0_1, %c0_2] : memref<16x128xf32, #tpu.memory_space<vmem>>, vector<16x128xf32>
    %cst = arith.constant dense<0.000000e+00> : vector<256x128xf32>
    %2 = tpu.matmul %0, %1, %cst {dimension_numbers = #tpu.dot_dimension_numbers<[1], [0], [0], [1], [0, 0, 1, 1], [], []>} : vector<256x16xf32>, vector<16x128xf32>, vector<256x128xf32> -> vector<256x128xf32>
    %3 = arith.truncf %2 : vector<256x128xf32> to vector<256x128xbf16>
    %c0_3 = arith.constant 0 : index
    %c0_4 = arith.constant 0 : index
    %4 = vector.load %arg4[%c0_3, %c0_4] : memref<256x128xbf16, #tpu.memory_space<vmem>>, vector<256x128xbf16>
    tpu.vector_store %arg4[%c0_3, %c0_4], %3 {strides = array<i32>} : memref<256x128xbf16, #tpu.memory_space<vmem>>, vector<256x128xbf16>,
    %c0_5 = arith.constant 0 : index
    %c0_6 = arith.constant 0 : index
    %5 = vector.load %arg3[%c0_5, %c0_6] : memref<128x2xf32, #tpu.memory_space<vmem>>, vector<128x2xf32>
    %cst_7 = arith.constant dense<0.000000e+00> : vector<256x2xf32>
    %6 = tpu.matmul %2, %5, %cst_7 {dimension_numbers = #tpu.dot_dimension_numbers<[1], [0], [0], [1], [0, 0, 1, 1], [], []>} : vector<256x128xf32>, vector<128x2xf32>, vector<256x2xf32> -> vector<256x2xf32>
    %c0_8 = arith.constant 0 : index
    %c0_9 = arith.constant 0 : index
    %7 = vector.load %arg5[%c0_8, %c0_9] : memref<256x2xf32, #tpu.memory_space<vmem>>, vector<256x2xf32>
    tpu.vector_store %arg5[%c0_8, %c0_9], %6 {strides = array<i32>} : memref<256x2xf32, #tpu.memory_space<vmem>>, vector<256x2xf32>,
    return
  }
  func.func @transform_0(%arg0: i32) -> (i32, i32) {
    %c0_i32 = arith.constant 0 : i32
    %c0_i32_0 = arith.constant 0 : i32
    return %arg0, %c0_i32 : i32, i32
  }
  func.func @transform_1(%arg0: i32) -> (i32, i32) {
    %c0_i32 = arith.constant 0 : i32
    %c0_i32_0 = arith.constant 0 : i32
    %c0_i32_1 = arith.constant 0 : i32
    return %c0_i32, %c0_i32_0 : i32, i32
  }
  func.func @transform_2(%arg0: i32) -> (i32, i32) {
    %c0_i32 = arith.constant 0 : i32
    %c0_i32_0 = arith.constant 0 : i32
    %c0_i32_1 = arith.constant 0 : i32
    return %c0_i32, %c0_i32_0 : i32, i32
  }
  func.func @transform_3(%arg0: i32) -> (i32, i32) {
    %c0_i32 = arith.constant 0 : i32
    %c0_i32_0 = arith.constant 0 : i32
    return %arg0, %c0_i32 : i32, i32
  }
  func.func @transform_4(%arg0: i32) -> (i32, i32) {
    %c0_i32 = arith.constant 0 : i32
    %c0_i32_0 = arith.constant 0 : i32
    return %arg0, %c0_i32 : i32, i32
  }
}

</mosaic_0001>

<bundles_post_ra>
// kernel: tpu_custom_call.1
= control target key start
LH: loop header
LB: loop body
LE: loop exit
PB: predicated region body
PF: predicated region fallthrough
CT: control target
= control target key end

     0   :  { %vm51_vm0 = vcmask 130048   ;;  %s1040_s0 = inlined_call_operand.vmem [shape: f32[256,16], index: 0, kind: input, shape index: {}]   ;;  %s1041_s1 = inlined_call_operand.vmem [shape: f32[16,128], index: 1, kind: input, shape index: {}]   ;;  %s1042_s2 = inlined_call_operand.vmem [shape: f32[128,2], index: 2, kind: input, shape index: {}]   ;;  %s1043_s3 = inlined_call_operand.hbm [shape: bf16[256,128], index: 3, kind: output, shape index: {0}]   ;;  %s1044_s4 = inlined_call_operand.vmem [shape: f32[256,2], index: 4, kind: output, shape index: {1}]  }
   0x1   :  { %v50_v0 = vld [vmem:[%s1041_s1 + $0x8] sm:$0xff]  ;;  %v49_v1 = vld [vmem:[%s1041_s1] sm:$0xff] }
   0x2   :  { %162 = vmatpush.msra.mxu0 %v50_v0  ;;  %v17_v2 = vld [vmem:[%s1040_s0] sm:$0xff]  ;;  %636 = vmatpush.msra.mxu3 %v50_v0 }
   0x3   :  { %10 = vsyncpa [#allocation3], 0  ;;  %v18_v3 = vld [vmem:[%s1040_s0 + $0x8] sm:$0xff]  ;;  %v19_v4 = vld [vmem:[%s1040_s0 + $0x10] sm:$0xff]  ;;  %vm454_vm1 = vcmask 15360   ;;  %s699_s30 = smov [#allocation2]  }
   0x4   :  { %163 = vmatpush.msra.mxu0 %v49_v1  ;;  %637 = vmatpush.msra.mxu3 %v49_v1  ;;  %v20_v5 = vld [vmem:[%s1040_s0 + $0x18] sm:$0xff]  ;;  %v21_v6 = vld [vmem:[%s1040_s0 + $0x20] sm:$0xff]  ;;  %v22_v7 = vld [vmem:[%s1040_s0 + $0x28] sm:$0xff]  ;;  %s493_s7 = sshll.u32 %s1043_s3, 4  ;;  %s700_s8 = smov 64   ;;  %s494_s7 = int_to_ptr.hbm [resolvable:$true] %s493_s7 }
   0x5   :  { %509 = vmatmul.msk.f32.vlgmr.msra.gmra.mxu0 %vm51_vm0, %v17_v2  ;;  %v23_v8 = vld [vmem:[%s1040_s0 + $0x30] sm:$0xff]  ;;  %v24_v9 = vld [vmem:[%s1040_s0 + $0x38] sm:$0xff]  ;;  %v25_v11 = vld [vmem:[%s1040_s0 + $0x40] sm:$0xff]  ;;  %s701_s9 = smov 4  }
   0x6   :  { %v340_v10 = vld [vmem:[%s1042_s2 + $0x78] sm:$0xff]  ;;  %v339_v12 = vld [vmem:[%s1042_s2 + $0x70] sm:$0xff]  ;;  %v338_v13 = vld [vmem:[%s1042_s2 + $0x68] sm:$0xff] }
   0x7   :  { %341 = vmatpush.msra.mxu1 %v340_v10  ;;  %638 = vmatpush.msra.mxu2 %v340_v10  ;;  %v337_v14 = vld [vmem:[%s1042_s2 + $0x60] sm:$0xff]  ;;  %v336_v15 = vld [vmem:[%s1042_s2 + $0x58] sm:$0xff]  ;;  %v26_v16 = vld [vmem:[%s1040_s0 + $0x48] sm:$0xff] }
   0x8   :  { %639 = vmatpush.msrb.mxu3 %v340_v10  ;;  %v335_v17 = vld [vmem:[%s1042_s2 + $0x50] sm:$0xff]  ;;  %v334_v18 = vld [vmem:[%s1042_s2 + $0x48] sm:$0xff]  ;;  %v333_v19 = vld [vmem:[%s1042_s2 + $0x40] sm:$0xff] }
   0x9   :  { %342 = vmatpush.msra.mxu1 %v339_v12  ;;  %640 = vmatpush.msra.mxu2 %v339_v12  ;;  %v332_v20 = vld [vmem:[%s1042_s2 + $0x38] sm:$0xff]  ;;  %v27_v21 = vld [vmem:[%s1040_s0 + $0x50] sm:$0xff]  ;;  %v330_v24 = vld [vmem:[%s1042_s2 + $0x28] sm:$0xff] }
   0xa   :  { %641 = vmatpush.msrb.mxu3 %v339_v12  ;;  %v331_v22 = vld [vmem:[%s1042_s2 + $0x30] sm:$0xff]  ;;  %v329_v25 = vld [vmem:[%s1042_s2 + $0x20] sm:$0xff]  ;;  %v328_v26 = vld [vmem:[%s1042_s2 + $0x18] sm:$0xff] }
   0xb   :  { %343 = vmatpush.msra.mxu1 %v338_v13  ;;  %642 = vmatpush.msra.mxu2 %v338_v13  ;;  %v35_v23 = vld [vmem:[%s1040_s0 + $0x90] sm:$0xff]  ;;  %v28_v27 = vld [vmem:[%s1040_s0 + $0x58] sm:$0xff]  ;;  %v326_v30 = vld [vmem:[%s1042_s2 + $0x8] sm:$0xff] }
   0xc   :  { %643 = vmatpush.msrb.mxu3 %v338_v13  ;;  %v327_v28 = vld [vmem:[%s1042_s2 + $0x10] sm:$0xff]  ;;  %v36_v29 = vld [vmem:[%s1040_s0 + $0x98] sm:$0xff]  ;;  %v325_v31 = vld [vmem:[%s1042_s2] sm:$0xff] }
   0xd   :  { %510 = vmatmul.msk.f32.gmra.mxu0 %vm51_vm0, %v18_v3  ;;  %344 = vmatpush.msra.mxu1 %v337_v14  ;;  %v29_v32 = vld [vmem:[%s1040_s0 + $0x60] sm:$0xff]  ;;  %v30_v34 = vld [vmem:[%s1040_s0 + $0x68] sm:$0xff]  ;;  %v31_v36 = vld [vmem:[%s1040_s0 + $0x70] sm:$0xff] }
   0xe   :  { %644 = vmatpush.msra.mxu2 %v337_v14  ;;  %645 = vmatpush.msrb.mxu3 %v337_v14  ;;  %v37_v33 = vld [vmem:[%s1040_s0 + $0xa0] sm:$0xff]  ;;  %v38_v35 = vld [vmem:[%s1040_s0 + $0xa8] sm:$0xff]  ;;  %v39_v37 = vld [vmem:[%s1040_s0 + $0xb0] sm:$0xff] }
   0xf   :  { %345 = vmatpush.msra.mxu1 %v336_v15  ;;  %527 = vmatmul.msk.f32.vlgmr.msra.gmra.mxu3 %vm51_vm0, %v35_v23  ;;  %v32_v38 = vld [vmem:[%s1040_s0 + $0x78] sm:$0xff]  ;;  %v33_v41 = vld [vmem:[%s1040_s0 + $0x80] sm:$0xff]  ;;  %v34_v44 = vld [vmem:[%s1040_s0 + $0x88] sm:$0xff] }
  0x10   :  { %646 = vmatpush.msra.mxu2 %v336_v15  ;;  %647 = vmatpush.msrb.mxu3 %v336_v15  ;;  %v40_v39 = vld [vmem:[%s1040_s0 + $0xb8] sm:$0xff]  ;;  %v41_v42 = vld [vmem:[%s1040_s0 + $0xc0] sm:$0xff]  ;;  %v42_v46 = vld [vmem:[%s1040_s0 + $0xc8] sm:$0xff] }
  0x11   :  { %346 = vmatpush.msra.mxu1 %v335_v17  ;;  %v43_v48 = vld [vmem:[%s1040_s0 + $0xd0] sm:$0xff]  ;;  %v44_v51 = vld [vmem:[%s1040_s0 + $0xd8] sm:$0xff]  ;;  %v45_v53 = vld [vmem:[%s1040_s0 + $0xe0] sm:$0xff] }
  0x12   :  { %648 = vmatpush.msra.mxu2 %v335_v17  ;;  %649 = vmatpush.msrb.mxu3 %v335_v17  ;;  %v46_v56 = vld [vmem:[%s1040_s0 + $0xe8] sm:$0xff]  ;;  %v47_v58 = vld [vmem:[%s1040_s0 + $0xf0] sm:$0xff]  ;;  %v48_v61 = vld [vmem:[%s1040_s0 + $0xf8] sm:$0xff]  ;;  %s491_s0 = sshll.u32 %s699_s30, 4  ;;  %s492_s0 = int_to_ptr.vmem [resolvable:$true] %s491_s0 }
  0x13   :  { %347 = vmatpush.msra.mxu1 %v334_v18 }
  0x14   :  { %650 = vmatpush.msra.mxu2 %v334_v18  ;;  %651 = vmatpush.msrb.mxu3 %v334_v18 }
  0x15   :  { %511 = vmatmul.msk.f32.gmra.mxu0 %vm51_vm0, %v19_v4  ;;  %348 = vmatpush.msra.mxu1 %v333_v19 }
  0x16   :  { %652 = vmatpush.msra.mxu2 %v333_v19  ;;  %653 = vmatpush.msrb.mxu3 %v333_v19 }
  0x17   :  { %349 = vmatpush.msra.mxu1 %v332_v20  ;;  %528 = vmatmul.msk.f32.gmra.mxu3 %vm51_vm0, %v36_v29 }
  0x18   :  { %654 = vmatpush.msra.mxu2 %v332_v20  ;;  %655 = vmatpush.msrb.mxu3 %v332_v20 }
  0x19   :  { %350 = vmatpush.msra.mxu1 %v331_v22 }
  0x1a   :  { %656 = vmatpush.msra.mxu2 %v331_v22  ;;  %657 = vmatpush.msrb.mxu3 %v331_v22 }
  0x1b   :  { %351 = vmatpush.msra.mxu1 %v330_v24 }
  0x1c   :  { %658 = vmatpush.msra.mxu2 %v330_v24  ;;  %659 = vmatpush.msrb.mxu3 %v330_v24 }
  0x1d   :  { %512 = vmatmul.msk.f32.gmra.mxu0 %vm51_vm0, %v20_v5  ;;  %352 = vmatpush.msra.mxu1 %v329_v25 }
  0x1e   :  { %660 = vmatpush.msra.mxu2 %v329_v25  ;;  %661 = vmatpush.msrb.mxu3 %v329_v25 }
  0x1f   :  { %353 = vmatpush.msra.mxu1 %v328_v26  ;;  %529 = vmatmul.msk.f32.gmra.mxu3 %vm51_vm0, %v37_v33 }
  0x20   :  { %662 = vmatpush.msra.mxu2 %v328_v26  ;;  %663 = vmatpush.msrb.mxu3 %v328_v26 }
  0x21   :  { %354 = vmatpush.msra.mxu1 %v327_v28 }
  0x22   :  { %664 = vmatpush.msra.mxu2 %v327_v28  ;;  %665 = vmatpush.msrb.mxu3 %v327_v28 }
  0x23   :  { %355 = vmatpush.msra.mxu1 %v326_v30 }
  0x24   :  { %666 = vmatpush.msra.mxu2 %v326_v30  ;;  %667 = vmatpush.msrb.mxu3 %v326_v30 }
  0x25   :  { %513 = vmatmul.msk.f32.gmra.mxu0 %vm51_vm0, %v21_v6  ;;  %356 = vmatpush.msra.mxu1 %v325_v31 }
  0x26   :  { %668 = vmatpush.msra.mxu2 %v325_v31  ;;  %669 = vmatpush.msrb.mxu3 %v325_v31 }
  0x27   :  { %530 = vmatmul.msk.f32.gmra.mxu3 %vm51_vm0, %v38_v35 }
  0x2d   :  { %514 = vmatmul.msk.f32.gmra.mxu0 %vm51_vm0, %v22_v7 }
  0x2f   :  { %531 = vmatmul.msk.f32.gmra.mxu3 %vm51_vm0, %v39_v37 }
  0x35   :  { %515 = vmatmul.msk.f32.gmra.mxu0 %vm51_vm0, %v23_v8 }
  0x37   :  { %532 = vmatmul.msk.f32.gmra.mxu3 %vm51_vm0, %v40_v39 }
  0x3d   :  { %516 = vmatmul.msk.f32.gmra.mxu0 %vm51_vm0, %v24_v9 }
  0x3f   :  { %533 = vmatmul.msk.f32.gmra.mxu3 %vm51_vm0, %v41_v42 }
  0x45   :  { %517 = vmatmul.msk.f32.gmra.mxu0 %vm51_vm0, %v25_v11 }
  0x47   :  { %534 = vmatmul.msk.f32.gmra.mxu3 %vm51_vm0, %v42_v46 }
  0x4d   :  { %518 = vmatmul.msk.f32.gmra.mxu0 %vm51_vm0, %v26_v16 }
  0x4f   :  { %535 = vmatmul.msk.f32.gmra.mxu3 %vm51_vm0, %v43_v48 }
  0x55   :  { %519 = vmatmul.msk.f32.gmra.mxu0 %vm51_vm0, %v27_v21 }
  0x57   :  { %536 = vmatmul.msk.f32.gmra.mxu3 %vm51_vm0, %v44_v51 }
  0x5d   :  { %520 = vmatmul.msk.f32.gmra.mxu0 %vm51_vm0, %v28_v27 }
  0x5f   :  { %537 = vmatmul.msk.f32.gmra.mxu3 %vm51_vm0, %v45_v53 }
  0x65   :  { %521 = vmatmul.msk.f32.gmra.mxu0 %vm51_vm0, %v29_v32 }
  0x67   :  { %538 = vmatmul.msk.f32.gmra.mxu3 %vm51_vm0, %v46_v56 }
  0x6d   :  { %522 = vmatmul.msk.f32.gmra.mxu0 %vm51_vm0, %v30_v34 }
  0x6f   :  { %539 = vmatmul.msk.f32.gmra.mxu3 %vm51_vm0, %v47_v58 }
  0x75   :  { %523 = vmatmul.msk.f32.gmra.mxu0 %vm51_vm0, %v31_v36 }
  0x77   :  { %540 = vmatmul.msk.f32.gmra.mxu3 %vm51_vm0, %v48_v61 }
  0x7d   :  { %524 = vmatmul.msk.f32.gmra.mxu0 %vm51_vm0, %v32_v38 }
  0x82   :  { %v165_v40 = vpop.f32.mrf.mxu0 }
  0x83   :  { %357 = vmatmul.f32.vlgmr.msra.gmra.mxu1 %v165_v40 }
  0x85   :  { %525 = vmatmul.msk.f32.gmra.mxu0 %vm51_vm0, %v33_v41 }
  0x8a   :  { %v168_v43 = vpop.f32.mrf.mxu0 }
  0x8b   :  { %v544_v45 = vpack.c.bf16 %v168_v43, %v165_v40  ;;  %360 = vmatmul.f32.gmra.mxu1 %v168_v43 }
  0x8d   :  { %545 = vst [vmem:[#allocation2] sm:$0xff] %v544_v45   ;;  %526 = vmatmul.msk.f32.gmra.mxu0 %vm51_vm0, %v34_v44 }
  0x92   :  { %v171_v47 = vpop.f32.mrf.mxu0  ;;  %v219_v3 = vpop.f32.mrf.mxu3 }
  0x93   :  { %363 = vmatmul.f32.gmra.mxu1 %v171_v47 }
  0x9a   :  { %v174_v49 = vpop.f32.mrf.mxu0  ;;  %v222_v6 = vpop.f32.mrf.mxu3 }
  0x9b   :  { %v549_v50 = vpack.c.bf16 %v174_v49, %v171_v47  ;;  %366 = vmatmul.f32.gmra.mxu1 %v174_v49  ;;  %v589_v7 = vpack.c.bf16 %v222_v6, %v219_v3 }
  0x9d   :  { %621 = vst [vmem:[#allocation2 + $0x8] sm:$0xff] %v549_v50  }
  0x9e   :  { %629 = vst [vmem:[#allocation2 + $0x48] sm:$0xff] %v589_v7  }
  0xa2   :  { %v177_v52 = vpop.f32.mrf.mxu0  ;;  %v225_v9 = vpop.f32.mrf.mxu3 }
  0xa3   :  { %369 = vmatmul.f32.gmra.mxu1 %v177_v52 }
  0xaa   :  { %v180_v54 = vpop.f32.mrf.mxu0  ;;  %v228_v12 = vpop.f32.mrf.mxu3 }
  0xab   :  { %v554_v55 = vpack.c.bf16 %v180_v54, %v177_v52  ;;  %372 = vmatmul.f32.gmra.mxu1 %v180_v54  ;;  %v594_v13 = vpack.c.bf16 %v228_v12, %v225_v9 }
  0xad   :  { %622 = vst [vmem:[#allocation2 + $0x10] sm:$0xff] %v554_v55  }
  0xae   :  { %630 = vst [vmem:[#allocation2 + $0x50] sm:$0xff] %v594_v13  }
  0xb2   :  { %v183_v57 = vpop.f32.mrf.mxu0  ;;  %v231_v15 = vpop.f32.mrf.mxu3 }
  0xb3   :  { %375 = vmatmul.f32.gmra.mxu1 %v183_v57 }
  0xba   :  { %v186_v59 = vpop.f32.mrf.mxu0  ;;  %v234_v19 = vpop.f32.mrf.mxu3 }
  0xbb   :  { %v559_v60 = vpack.c.bf16 %v186_v59, %v183_v57  ;;  %378 = vmatmul.f32.gmra.mxu1 %v186_v59  ;;  %v599_v20 = vpack.c.bf16 %v234_v19, %v231_v15 }
  0xbd   :  { %623 = vst [vmem:[#allocation2 + $0x18] sm:$0xff] %v559_v60  }
  0xbe   :  { %631 = vst [vmem:[#allocation2 + $0x58] sm:$0xff] %v599_v20  }
  0xc2   :  { %v189_v62 = vpop.f32.mrf.mxu0  ;;  %v237_v23 = vpop.f32.mrf.mxu3 }
  0xc3   :  { %381 = vmatmul.f32.gmra.mxu1 %v189_v62 }
  0xca   :  { %v192_v63 = vpop.f32.mrf.mxu0  ;;  %v240_v26 = vpop.f32.mrf.mxu3 }
  0xcb   :  { %v564_v0 = vpack.c.bf16 %v192_v63, %v189_v62  ;;  %384 = vmatmul.f32.gmra.mxu1 %v192_v63  ;;  %v604_v27 = vpack.c.bf16 %v240_v26, %v237_v23 }
  0xcd   :  { %624 = vst [vmem:[#allocation2 + $0x20] sm:$0xff] %v564_v0  }
  0xce   :  { %632 = vst [vmem:[#allocation2 + $0x60] sm:$0xff] %v604_v27  }
  0xd2   :  { %v195_v1 = vpop.f32.mrf.mxu0  ;;  %v243_v29 = vpop.f32.mrf.mxu3 }
  0xd3   :  { %387 = vmatmul.f32.gmra.mxu1 %v195_v1 }
  0xda   :  { %v198_v2 = vpop.f32.mrf.mxu0  ;;  %v246_v31 = vpop.f32.mrf.mxu3 }
  0xdb   :  { %v569_v4 = vpack.c.bf16 %v198_v2, %v195_v1  ;;  %390 = vmatmul.f32.gmra.mxu1 %v198_v2  ;;  %v609_v32 = vpack.c.bf16 %v246_v31, %v243_v29 }
  0xdd   :  { %625 = vst [vmem:[#allocation2 + $0x28] sm:$0xff] %v569_v4  }
  0xde   :  { %633 = vst [vmem:[#allocation2 + $0x68] sm:$0xff] %v609_v32  }
  0xe2   :  { %v201_v5 = vpop.f32.mrf.mxu0  ;;  %v249_v34 = vpop.f32.mrf.mxu3 }
  0xe3   :  { %393 = vmatmul.f32.gmra.mxu1 %v201_v5 }
  0xea   :  { %v204_v8 = vpop.f32.mrf.mxu0  ;;  %v252_v36 = vpop.f32.mrf.mxu3 }
  0xeb   :  { %v574_v10 = vpack.c.bf16 %v204_v8, %v201_v5  ;;  %396 = vmatmul.f32.gmra.mxu1 %v204_v8  ;;  %v614_v37 = vpack.c.bf16 %v252_v36, %v249_v34 }
  0xed   :  { %626 = vst [vmem:[#allocation2 + $0x30] sm:$0xff] %v574_v10  }
  0xee   :  { %634 = vst [vmem:[#allocation2 + $0x70] sm:$0xff] %v614_v37  }
  0xf2   :  { %v207_v11 = vpop.f32.mrf.mxu0  ;;  %v255_v39 = vpop.f32.mrf.mxu3 }
  0xf3   :  { %399 = vmatmul.f32.gmra.mxu1 %v207_v11  ;;  %447 = vmatmul.f32.vlgmr.msrb.gmra.mxu3 %v255_v39 }
  0xfa   :  { %v210_v14 = vpop.f32.mrf.mxu0  ;;  %v258_v41 = vpop.f32.mrf.mxu3 }
  0xfb   :  { %v579_v16 = vpack.c.bf16 %v210_v14, %v207_v11  ;;  %402 = vmatmul.f32.vlgmr.msra.gmra.mxu2 %v210_v14  ;;  %v619_v42 = vpack.c.bf16 %v258_v41, %v255_v39  ;;  %450 = vmatmul.f32.gmra.mxu3 %v258_v41 }
  0xfd   :  { %627 = vst [vmem:[#allocation2 + $0x38] sm:$0xff] %v579_v16  }
  0xfe   :  { %635 = vst [vmem:[#allocation2 + $0x78] sm:$0xff] %v619_v42  }
 0x100   :  { %v358_v17 = vpop.f32.mrf.mxu1 }
 0x101   :  { %455 = vst.msk [vmem:[%s1044_s4] sm:$0xff] %vm454_vm1, %v358_v17 }
 0x102   :  { %v213_v18 = vpop.f32.mrf.mxu0 }
 0x103   :  { %405 = vmatmul.f32.gmra.mxu2 %v213_v18 }
 0x108   :  { %v361_v21 = vpop.f32.mrf.mxu1 }
 0x109   :  { %456 = vst.msk [vmem:[%s1044_s4 + $0x8] sm:$0xff] %vm454_vm1, %v361_v21 }
 0x10a   :  { %v216_v22 = vpop.f32.mrf.mxu0 }
 0x10b   :  { %v584_v24 = vpack.c.bf16 %v216_v22, %v213_v18  ;;  %408 = vmatmul.f32.gmra.mxu2 %v216_v22 }
 0x10d   :  { %628 = vst [vmem:[#allocation2 + $0x40] sm:$0xff] %v584_v24  }
 0x10e   :  { %499 = dma.vmem_to_hbm [thread:$0]  %s492_s0, 2048, %s494_s7, [#allocation3], %s700_s8, %s700_s8, %s701_s9  }
 0x110   :  { %v364_v25 = vpop.f32.mrf.mxu1 }
 0x111   :  { %457 = vst.msk [vmem:[%s1044_s4 + $0x10] sm:$0xff] %vm454_vm1, %v364_v25 }
 0x113   :  { %411 = vmatmul.f32.gmra.mxu2 %v219_v3 }
 0x118   :  { %v367_v28 = vpop.f32.mrf.mxu1 }
 0x119   :  { %458 = vst.msk [vmem:[%s1044_s4 + $0x18] sm:$0xff] %vm454_vm1, %v367_v28 }
 0x11b   :  { %414 = vmatmul.f32.gmra.mxu2 %v222_v6 }
 0x120   :  { %v370_v30 = vpop.f32.mrf.mxu1 }
 0x121   :  { %459 = vst.msk [vmem:[%s1044_s4 + $0x20] sm:$0xff] %vm454_vm1, %v370_v30 }
 0x123   :  { %417 = vmatmul.f32.gmra.mxu2 %v225_v9 }
 0x128   :  { %v373_v33 = vpop.f32.mrf.mxu1 }
 0x129   :  { %460 = vst.msk [vmem:[%s1044_s4 + $0x28] sm:$0xff] %vm454_vm1, %v373_v33 }
 0x12b   :  { %420 = vmatmul.f32.gmra.mxu2 %v228_v12 }
 0x130   :  { %v376_v35 = vpop.f32.mrf.mxu1 }
 0x131   :  { %461 = vst.msk [vmem:[%s1044_s4 + $0x30] sm:$0xff] %vm454_vm1, %v376_v35 }
 0x133   :  { %423 = vmatmul.f32.gmra.mxu2 %v231_v15 }
 0x138   :  { %v379_v38 = vpop.f32.mrf.mxu1 }
 0x139   :  { %462 = vst.msk [vmem:[%s1044_s4 + $0x38] sm:$0xff] %vm454_vm1, %v379_v38 }
 0x13b   :  { %426 = vmatmul.f32.gmra.mxu2 %v234_v19 }
 0x140   :  { %v382_v40 = vpop.f32.mrf.mxu1 }
 0x141   :  { %463 = vst.msk [vmem:[%s1044_s4 + $0x40] sm:$0xff] %vm454_vm1, %v382_v40 }
 0x143   :  { %429 = vmatmul.f32.gmra.mxu2 %v237_v23 }
 0x148   :  { %v385_v43 = vpop.f32.mrf.mxu1 }
 0x149   :  { %464 = vst.msk [vmem:[%s1044_s4 + $0x48] sm:$0xff] %vm454_vm1, %v385_v43 }
 0x14b   :  { %432 = vmatmul.f32.gmra.mxu2 %v240_v26 }
 0x150   :  { %v388_v44 = vpop.f32.mrf.mxu1 }
 0x151   :  { %465 = vst.msk [vmem:[%s1044_s4 + $0x50] sm:$0xff] %vm454_vm1, %v388_v44 }
 0x153   :  { %435 = vmatmul.f32.gmra.mxu2 %v243_v29 }
 0x158   :  { %v391_v45 = vpop.f32.mrf.mxu1 }
 0x159   :  { %466 = vst.msk [vmem:[%s1044_s4 + $0x58] sm:$0xff] %vm454_vm1, %v391_v45 }
 0x15b   :  { %438 = vmatmul.f32.gmra.mxu2 %v246_v31 }
 0x160   :  { %v394_v46 = vpop.f32.mrf.mxu1 }
 0x161   :  { %467 = vst.msk [vmem:[%s1044_s4 + $0x60] sm:$0xff] %vm454_vm1, %v394_v46 }
 0x163   :  { %441 = vmatmul.f32.gmra.mxu2 %v249_v34 }
 0x168   :  { %v397_v47 = vpop.f32.mrf.mxu1 }
 0x169   :  { %468 = vst.msk [vmem:[%s1044_s4 + $0x68] sm:$0xff] %vm454_vm1, %v397_v47 }
 0x16b   :  { %444 = vmatmul.f32.gmra.mxu2 %v252_v36 }
 0x170   :  { %v400_v48 = vpop.f32.mrf.mxu1 }
 0x171   :  { %469 = vst.msk [vmem:[%s1044_s4 + $0x70] sm:$0xff] %vm454_vm1, %v400_v48 }
 0x176   :  { %v448_v59 = vpop.f32.mrf.mxu3 }
 0x177   :  { %485 = vst.msk [vmem:[%s1044_s4 + $0xf0] sm:$0xff] %vm454_vm1, %v448_v59 }
 0x17e   :  { %v403_v49 = vpop.f32.mrf.mxu2  ;;  %v451_v61 = vpop.f32.mrf.mxu3 }
 0x17f   :  { %470 = vst.msk [vmem:[%s1044_s4 + $0x78] sm:$0xff] %vm454_vm1, %v403_v49 }
 0x180   :  { %486 = vst.msk [vmem:[%s1044_s4 + $0xf8] sm:$0xff] %vm454_vm1, %v451_v61 }
 0x186   :  { %v406_v50 = vpop.f32.mrf.mxu2 }
 0x187   :  { %471 = vst.msk [vmem:[%s1044_s4 + $0x80] sm:$0xff] %vm454_vm1, %v406_v50 }
 0x18e   :  { %v409_v51 = vpop.f32.mrf.mxu2 }
 0x18f   :  { %472 = vst.msk [vmem:[%s1044_s4 + $0x88] sm:$0xff] %vm454_vm1, %v409_v51 }
 0x196   :  { %v412_v52 = vpop.f32.mrf.mxu2 }
 0x197   :  { %473 = vst.msk [vmem:[%s1044_s4 + $0x90] sm:$0xff] %vm454_vm1, %v412_v52 }
 0x19e   :  { %v415_v53 = vpop.f32.mrf.mxu2 }
 0x19f   :  { %474 = vst.msk [vmem:[%s1044_s4 + $0x98] sm:$0xff] %vm454_vm1, %v415_v53 }
 0x1a6   :  { %v418_v54 = vpop.f32.mrf.mxu2 }
 0x1a7   :  { %475 = vst.msk [vmem:[%s1044_s4 + $0xa0] sm:$0xff] %vm454_vm1, %v418_v54 }
 0x1ae   :  { %v421_v55 = vpop.f32.mrf.mxu2 }
 0x1af   :  { %476 = vst.msk [vmem:[%s1044_s4 + $0xa8] sm:$0xff] %vm454_vm1, %v421_v55 }
 0x1b6   :  { %v424_v56 = vpop.f32.mrf.mxu2 }
 0x1b7   :  { %477 = vst.msk [vmem:[%s1044_s4 + $0xb0] sm:$0xff] %vm454_vm1, %v424_v56 }
 0x1be   :  { %v427_v57 = vpop.f32.mrf.mxu2 }
 0x1bf   :  { %478 = vst.msk [vmem:[%s1044_s4 + $0xb8] sm:$0xff] %vm454_vm1, %v427_v57 }
 0x1c6   :  { %v430_v58 = vpop.f32.mrf.mxu2 }
 0x1c7   :  { %479 = vst.msk [vmem:[%s1044_s4 + $0xc0] sm:$0xff] %vm454_vm1, %v430_v58 }
 0x1ce   :  { %v433_v60 = vpop.f32.mrf.mxu2 }
 0x1cf   :  { %480 = vst.msk [vmem:[%s1044_s4 + $0xc8] sm:$0xff] %vm454_vm1, %v433_v60 }
 0x1d6   :  { %v436_v62 = vpop.f32.mrf.mxu2 }
 0x1d7   :  { %481 = vst.msk [vmem:[%s1044_s4 + $0xd0] sm:$0xff] %vm454_vm1, %v436_v62 }
 0x1de   :  { %v439_v63 = vpop.f32.mrf.mxu2 }
 0x1df   :  { %482 = vst.msk [vmem:[%s1044_s4 + $0xd8] sm:$0xff] %vm454_vm1, %v439_v63 }
 0x1e6   :  { %v442_v0 = vpop.f32.mrf.mxu2 }
 0x1e7   :  { %483 = vst.msk [vmem:[%s1044_s4 + $0xe0] sm:$0xff] %vm454_vm1, %v442_v0 }
 0x1ee   :  { %v445_v1 = vpop.f32.mrf.mxu2 }
 0x1ef   :  { %484 = vst.msk [vmem:[%s1044_s4 + $0xe8] sm:$0xff] %vm454_vm1, %v445_v1 }
 0x1f0   :  { %697 = dma.done.wait [#allocation3], 2048  }
 0x1f1   :  { %698 = vsyncadd [#allocation3], 4294965248 }
 0x1f2   :  { %508 = vsyncpa [#allocation3], 1 }

</bundles_post_ra>
